<compile_context>
chip_gen: v7x
topology: tpu7x:2x2x1
jax: 0.10.0
libtpu: 0.0.40
codegen_flags: <defaults>
</compile_context>

<pallas_src>
import functools

import jax
import jax.numpy as jnp
from jax.experimental import pallas as pl
from jax.experimental.pallas import tpu as pltpu

IN_LEN = 512      # nn.Linear(in_len=512, ...)
OUT_LEN = 10      # nn.Linear(..., out_len=10)
BATCH = 2

SUBLANE = 8
MAX_TM = 1024     # row-tile cap for large batches


def _round_up(x, m):
    return (x + m - 1) // m * m


# ------------------------------ Pallas kernel --------------------------------
def _linear_kernel(x_ref, w_ref, b_ref, o_ref):
    """o = x @ w + b;  x:(TM,K)  w:(K,N)  b:(1,N)  o:(TM,N)."""
    acc = jnp.dot(x_ref[...], w_ref[...], preferred_element_type=jnp.float32)
    o_ref[...] = (acc + b_ref[...]).astype(o_ref.dtype)


# ------------------------------ parameter prep (once, at init) ----------------
def prepare_params(weight, bias):
    """One-time: PyTorch (N, K) weight -> (K, N), bias -> (1, N)."""
    w_t = jnp.asarray(weight, jnp.float32).T           # (K, N)
    b2 = jnp.asarray(bias, jnp.float32).reshape(1, -1)  # (1, N)
    return w_t, b2


# ------------------------------ wrapper ---------------------------------------
def _pick_tiling(M):
    """Return (TM, Mp): row-tile size and padded batch."""
    if M < 16:
        # Single full-dim block: legal (block dim == array dim), no padding,
        # no grid overhead.  Nothing to shard at this size anyway.
        return M, M
    Mp = _round_up(M, SUBLANE)
    # At least 2 tiles (v7x two-TC sharding), tiles up to MAX_TM rows so the
    # ~0.35us/step pipeline overhead stays amortized.
    TM = min(MAX_TM, _round_up(pl.cdiv(Mp, 2), SUBLANE))
    Mp = _round_up(Mp, TM)
    return TM, Mp


@functools.partial(jax.jit, static_argnames=())
def _mlp_forward_impl(x, w_t, b2):
    M, K = x.shape
    N = w_t.shape[1]
    TM, Mp = _pick_tiling(M)

    if Mp != M:
        x_in = jnp.pad(x, ((0, Mp - M), (0, 0)))
    else:
        x_in = x

    out = pl.pallas_call(
        _linear_kernel,
        out_shape=jax.ShapeDtypeStruct((Mp, N), jnp.float32),
        grid=(Mp // TM,),
        in_specs=[
            pl.BlockSpec((TM, K), lambda i: (i, 0)),   # x rows stream
            pl.BlockSpec((K, N), lambda i: (0, 0)),    # weight resident
            pl.BlockSpec((1, N), lambda i: (0, 0)),    # bias resident
        ],
        out_specs=pl.BlockSpec((TM, N), lambda i: (i, 0)),
        compiler_params=pltpu.CompilerParams(
            dimension_semantics=("parallel",)),
    )(x_in, w_t, b2)

    if Mp != M:
        out = out[:M]
    return out


def mlp_forward(x, w_t, b2):
    """Equivalent of `nn.Linear(in_len, out_len)(x)` given prepared params.

    x:   (M, K) float32
    w_t: (K, N) float32   (already transposed by prepare_params)
    b2:  (1, N) float32
    returns (M, N) float32
    """
    return _mlp_forward_impl(x, w_t, b2)


# ------------------------------ parameters ------------------------------------
def init_params(key, in_len=IN_LEN, out_len=OUT_LEN):
    kw, kb = jax.random.split(key)
    bound = 1.0 / jnp.sqrt(in_len)
    return {
        "weight": jax.random.uniform(kw, (out_len, in_len), jnp.float32,
                                     -bound, bound),
        "bias": jax.random.uniform(kb, (out_len,), jnp.float32,
                                   -bound, bound),
    }


# ---------------------------------- main --------------------------------------
if __name__ == "__main__":
    key = jax.random.PRNGKey(0)
    kx, kp = jax.random.split(key)

    x = jax.random.normal(kx, (BATCH, IN_LEN), jnp.float32)
    params = init_params(kp)

    # One-time parameter preparation (hoisted out of the per-call path).
    w_t, b2 = prepare_params(params["weight"], params["bias"])
    w_t, b2 = jax.block_until_ready((w_t, b2))

    out = mlp_forward(x, w_t, b2)
    out = jax.block_until_ready(out)

    assert out.shape == (BATCH, OUT_LEN), out.shape
    assert out.dtype == jnp.float32
    assert bool(jnp.all(jnp.isfinite(out)))

    # Numerical check against the plain-JAX reference of nn.Linear.
    ref = x @ params["weight"].T + params["bias"]
    assert bool(jnp.allclose(out, ref, rtol=2e-3, atol=2e-3)), (
        float(jnp.max(jnp.abs(out - ref))))

    # Also exercise the multi-tile ("parallel" grid) path once.
    x_big = jax.random.normal(kx, (96, IN_LEN), jnp.float32)
    out_big = jax.block_until_ready(mlp_forward(x_big, w_t, b2))
    ref_big = x_big @ params["weight"].T + params["bias"]
    assert bool(jnp.allclose(out_big, ref_big, rtol=2e-3, atol=2e-3))

    print("KERNEL_OK")
</pallas_src>

<mosaic_0001>
module attributes {stable_mosaic.version = 11 : i64} {
  func.func @_linear_kernel(%arg0: i32, %arg1: memref<2x512xf32, #tpu.memory_space<vmem>>, %arg2: memref<512x10xf32, #tpu.memory_space<vmem>>, %arg3: memref<1x10xf32, #tpu.memory_space<vmem>>, %arg4: memref<2x10xf32, #tpu.memory_space<vmem>>) attributes {dimension_semantics = [#tpu.dimension_semantics<parallel>], iteration_bounds = array<i64: 1>, scalar_prefetch = 0 : i64, scratch_operands = 0 : i64, tpu.core_type = #tpu.core_type<tc>, window_params = [{transform_indices = @transform_0, window_bounds = array<i64: 2, 512>}, {pipeline_mode = #tpu.pipeline_mode<synchronous>, transform_indices = @transform_1, window_bounds = array<i64: 512, 10>}, {pipeline_mode = #tpu.pipeline_mode<synchronous>, transform_indices = @transform_2, window_bounds = array<i64: 1, 10>}, {transform_indices = @transform_3, window_bounds = array<i64: 2, 10>}]} {
    %c0 = arith.constant 0 : index
    %c0_0 = arith.constant 0 : index
    %0 = vector.load %arg1[%c0, %c0_0] : memref<2x512xf32, #tpu.memory_space<vmem>>, vector<2x512xf32>
    %c0_1 = arith.constant 0 : index
    %c0_2 = arith.constant 0 : index
    %1 = vector.load %arg2[%c0_1, %c0_2] : memref<512x10xf32, #tpu.memory_space<vmem>>, vector<512x10xf32>
    %cst = arith.constant dense<0.000000e+00> : vector<2x10xf32>
    %2 = tpu.matmul %0, %1, %cst {dimension_numbers = #tpu.dot_dimension_numbers<[1], [0], [0], [1], [0, 0, 1, 1], [], []>} : vector<2x512xf32>, vector<512x10xf32>, vector<2x10xf32> -> vector<2x10xf32>
    %c0_3 = arith.constant 0 : index
    %c0_4 = arith.constant 0 : index
    %3 = vector.load %arg3[%c0_3, %c0_4] : memref<1x10xf32, #tpu.memory_space<vmem>>, vector<1x10xf32>
    %4 = vector.broadcast %3 : vector<1x10xf32> to vector<2x10xf32>
    %5 = arith.addf %2, %4 : vector<2x10xf32>
    %c0_5 = arith.constant 0 : index
    %c0_6 = arith.constant 0 : index
    %6 = vector.load %arg4[%c0_5, %c0_6] : memref<2x10xf32, #tpu.memory_space<vmem>>, vector<2x10xf32>
    tpu.vector_store %arg4[%c0_5, %c0_6], %5 {strides = array<i32>} : memref<2x10xf32, #tpu.memory_space<vmem>>, vector<2x10xf32>,
    return
  }
  func.func @transform_0(%arg0: i32) -> (i32, i32) {
    %c0_i32 = arith.constant 0 : i32
    %c0_i32_0 = arith.constant 0 : i32
    return %arg0, %c0_i32 : i32, i32
  }
  func.func @transform_1(%arg0: i32) -> (i32, i32) {
    %c0_i32 = arith.constant 0 : i32
    %c0_i32_0 = arith.constant 0 : i32
    %c0_i32_1 = arith.constant 0 : i32
    return %c0_i32, %c0_i32_0 : i32, i32
  }
  func.func @transform_2(%arg0: i32) -> (i32, i32) {
    %c0_i32 = arith.constant 0 : i32
    %c0_i32_0 = arith.constant 0 : i32
    %c0_i32_1 = arith.constant 0 : i32
    return %c0_i32, %c0_i32_0 : i32, i32
  }
  func.func @transform_3(%arg0: i32) -> (i32, i32) {
    %c0_i32 = arith.constant 0 : i32
    %c0_i32_0 = arith.constant 0 : i32
    return %arg0, %c0_i32 : i32, i32
  }
}

</mosaic_0001>

<bundles_post_ra>
// kernel: _mlp_forward_impl.1
= control target key start
LH: loop header
LB: loop body
LE: loop exit
PB: predicated region body
PF: predicated region fallthrough
CT: control target
= control target key end

     0   :  { %v427_v47 = vmov 1983009808   ;;  %v92_v49 = vlaneseq  ;;  %s659_s0 = inlined_call_operand.vmem [shape: f32[2,512], index: 0, kind: input, shape index: {}]   ;;  %s660_s1 = inlined_call_operand.vmem [shape: f32[512,10], index: 1, kind: input, shape index: {}]   ;;  %s661_s2 = inlined_call_operand.vmem [shape: f32[1,10], index: 2, kind: input, shape index: {}]   ;;  %s662_s3 = inlined_call_operand.hbm [shape: f32[2,10], index: 3, kind: output, shape index: {}]  }
   0x1   :  { %v32_v0 = vld [vmem:[%s660_s1 + $0x80] sm:$0xff]  ;;  %v33_v1 = vld [vmem:[%s660_s1 + $0x88] sm:$0xff]  ;;  %v34_v11 = vld [vmem:[%s660_s1 + $0x90] sm:$0xff]  ;;  %v90_v48 = vunpack.c.l.s4 %v427_v47 }
   0x2   :  { %v16_v2 = vld [vmem:[%s660_s1] sm:$0xff]  ;;  %v336_v3 = vpack.c.bf16 %v33_v1, %v32_v0  ;;  %v17_v4 = vld [vmem:[%s660_s1 + $0x8] sm:$0xff]  ;;  %v35_v13 = vld [vmem:[%s660_s1 + $0x98] sm:$0xff]  ;;  %v93_v0 = vshrl.u32 %v92_v49, 7 }
   0x3   :  { %v64_v5 = vld [vmem:[%s660_s1 + $0x180] sm:$0xff]  ;;  %v65_v6 = vld [vmem:[%s660_s1 + $0x188] sm:$0xff]  ;;  %v338_v7 = vpack.c.bf16 %v17_v4, %v16_v2  ;;  %v18_v14 = vld [vmem:[%s660_s1 + $0x10] sm:$0xff]  ;;  %v340_v16 = vpack.c.bf16 %v35_v13, %v34_v11  ;;  %v91_v63 = vunpack.c.0.s8 %v90_v48 }
   0x4   :  { %v368_v8 = vpack.c.bf16 %v65_v6, %v64_v5  ;;  %v48_v9 = vld [vmem:[%s660_s1 + $0x100] sm:$0xff]  ;;  %v49_v10 = vld [vmem:[%s660_s1 + $0x108] sm:$0xff]  ;;  %337 = vmatprep.subr.bf16.mxu0 %v336_v3  ;;  %v19_v15 = vld [vmem:[%s660_s1 + $0x18] sm:$0xff] }
   0x5   :  { %v370_v12 = vpack.c.bf16 %v49_v10, %v48_v9  ;;  %339 = vmatpush3.bf16.msra.mxu0 %v338_v7  ;;  %v342_v17 = vpack.c.bf16 %v19_v15, %v18_v14  ;;  %v66_v18 = vld [vmem:[%s660_s1 + $0x190] sm:$0xff]  ;;  %v67_v19 = vld [vmem:[%s660_s1 + $0x198] sm:$0xff]  ;;  %v36_v23 = vld [vmem:[%s660_s1 + $0xa0] sm:$0xff]  ;;  %v94_v13 = vsub.s32 %v91_v63, %v93_v0 }
   0x6   :  { %369 = vmatprep.subr.bf16.mxu1 %v368_v8  ;;  %v50_v20 = vld [vmem:[%s660_s1 + $0x110] sm:$0xff]  ;;  %v372_v21 = vpack.c.bf16 %v67_v19, %v66_v18  ;;  %v51_v22 = vld [vmem:[%s660_s1 + $0x118] sm:$0xff]  ;;  %v37_v24 = vld [vmem:[%s660_s1 + $0xa8] sm:$0xff]  ;;  %341 = vmatprep.subr.bf16.mxu0 %v340_v16 }
   0x7   :  { %371 = vmatpush3.bf16.msra.mxu1 %v370_v12  ;;  %v374_v25 = vpack.c.bf16 %v51_v22, %v50_v20  ;;  %v344_v26 = vpack.c.bf16 %v37_v24, %v36_v23  ;;  %v20_v27 = vld [vmem:[%s660_s1 + $0x20] sm:$0xff]  ;;  %v21_v28 = vld [vmem:[%s660_s1 + $0x28] sm:$0xff]  ;;  %v38_v35 = vld [vmem:[%s660_s1 + $0xb0] sm:$0xff] }
   0x8   :  { %v68_v29 = vld [vmem:[%s660_s1 + $0x1a0] sm:$0xff]  ;;  %373 = vmatprep.subr.bf16.mxu1 %v372_v21  ;;  %v69_v30 = vld [vmem:[%s660_s1 + $0x1a8] sm:$0xff]  ;;  %v346_v33 = vpack.c.bf16 %v21_v28, %v20_v27  ;;  %v39_v36 = vld [vmem:[%s660_s1 + $0xb8] sm:$0xff] }
   0x9   :  { %v52_v31 = vld [vmem:[%s660_s1 + $0x120] sm:$0xff]  ;;  %v53_v32 = vld [vmem:[%s660_s1 + $0x128] sm:$0xff]  ;;  %343 = vmatpush3.bf16.msra.mxu0 %v342_v17  ;;  %v376_v34 = vpack.c.bf16 %v69_v30, %v68_v29  ;;  %v22_v37 = vld [vmem:[%s660_s1 + $0x30] sm:$0xff]  ;;  %v348_v39 = vpack.c.bf16 %v39_v36, %v38_v35 }
   0xa   :  { %345 = vmatprep.subr.bf16.mxu0 %v344_v26  ;;  %v378_v38 = vpack.c.bf16 %v53_v32, %v52_v31  ;;  %v23_v40 = vld [vmem:[%s660_s1 + $0x38] sm:$0xff]  ;;  %v70_v41 = vld [vmem:[%s660_s1 + $0x1b0] sm:$0xff]  ;;  %v40_v46 = vld [vmem:[%s660_s1 + $0xc0] sm:$0xff] }
   0xb   :  { %375 = vmatpush3.bf16.msra.mxu1 %v374_v25  ;;  %v71_v42 = vld [vmem:[%s660_s1 + $0x1b8] sm:$0xff]  ;;  %v54_v44 = vld [vmem:[%s660_s1 + $0x130] sm:$0xff]  ;;  %v41_v50 = vld [vmem:[%s660_s1 + $0xc8] sm:$0xff]  ;;  %v350_v51 = vpack.c.bf16 %v23_v40, %v22_v37 }
   0xc   :  { %377 = vmatprep.subr.bf16.mxu1 %v376_v34  ;;  %v380_v43 = vpack.c.bf16 %v71_v42, %v70_v41  ;;  %v55_v45 = vld [vmem:[%s660_s1 + $0x138] sm:$0xff]  ;;  %v72_v52 = vld [vmem:[%s660_s1 + $0x1c0] sm:$0xff]  ;;  %v73_v53 = vld [vmem:[%s660_s1 + $0x1c8] sm:$0xff]  ;;  %v352_v55 = vpack.c.bf16 %v41_v50, %v40_v46 }
   0xd   :  { %347 = vmatpush3.bf16.msra.mxu0 %v346_v33  ;;  %v382_v54 = vpack.c.bf16 %v55_v45, %v54_v44  ;;  %v24_v56 = vld [vmem:[%s660_s1 + $0x40] sm:$0xff]  ;;  %v25_v57 = vld [vmem:[%s660_s1 + $0x48] sm:$0xff]  ;;  %v384_v59 = vpack.c.bf16 %v73_v53, %v72_v52  ;;  %v42_v61 = vld [vmem:[%s660_s1 + $0xd0] sm:$0xff] }
   0xe   :  { %349 = vmatprep.subr.bf16.mxu0 %v348_v39  ;;  %v56_v58 = vld [vmem:[%s660_s1 + $0x140] sm:$0xff]  ;;  %v57_v60 = vld [vmem:[%s660_s1 + $0x148] sm:$0xff]  ;;  %v43_v62 = vld [vmem:[%s660_s1 + $0xd8] sm:$0xff]  ;;  %v354_v3 = vpack.c.bf16 %v25_v57, %v24_v56 }
   0xf   :  { %379 = vmatpush3.bf16.msra.mxu1 %v378_v38  ;;  %v74_v1 = vld [vmem:[%s660_s1 + $0x1d0] sm:$0xff]  ;;  %v75_v2 = vld [vmem:[%s660_s1 + $0x1d8] sm:$0xff]  ;;  %v386_v4 = vpack.c.bf16 %v57_v60, %v56_v58  ;;  %v356_v5 = vpack.c.bf16 %v43_v62, %v42_v61  ;;  %v44_v11 = vld [vmem:[%s660_s1 + $0xe0] sm:$0xff] }
  0x10   :  { %381 = vmatprep.subr.bf16.mxu1 %v380_v43  ;;  %v26_v6 = vld [vmem:[%s660_s1 + $0x50] sm:$0xff]  ;;  %v27_v7 = vld [vmem:[%s660_s1 + $0x58] sm:$0xff]  ;;  %v388_v9 = vpack.c.bf16 %v75_v2, %v74_v1  ;;  %v45_v12 = vld [vmem:[%s660_s1 + $0xe8] sm:$0xff] }
  0x11   :  { %351 = vmatpush3.bf16.msra.mxu0 %v350_v51  ;;  %v58_v8 = vld [vmem:[%s660_s1 + $0x150] sm:$0xff]  ;;  %v59_v10 = vld [vmem:[%s660_s1 + $0x158] sm:$0xff]  ;;  %v76_v14 = vld [vmem:[%s660_s1 + $0x1e0] sm:$0xff]  ;;  %v358_v16 = vpack.c.bf16 %v27_v7, %v26_v6  ;;  %v360_v20 = vpack.c.bf16 %v45_v12, %v44_v11 }
  0x12   :  { %353 = vmatprep.subr.bf16.mxu0 %v352_v55  ;;  %v77_v15 = vld [vmem:[%s660_s1 + $0x1e8] sm:$0xff]  ;;  %v28_v17 = vld [vmem:[%s660_s1 + $0x60] sm:$0xff]  ;;  %v390_v19 = vpack.c.bf16 %v59_v10, %v58_v8 }
  0x13   :  { %383 = vmatpush3.bf16.msra.mxu1 %v382_v54  ;;  %v29_v18 = vld [vmem:[%s660_s1 + $0x68] sm:$0xff]  ;;  %v60_v21 = vld [vmem:[%s660_s1 + $0x160] sm:$0xff] }
  0x14   :  { %385 = vmatprep.subr.bf16.mxu1 %v384_v59  ;;  %v15_v22 = vld [vmem:[%s659_s0] sm:$0xff] }
  0x15   :  { %355 = vmatpush3.bf16.msra.mxu0 %v354_v3 }
  0x16   :  { %357 = vmatprep.subr.bf16.mxu0 %v356_v5 }
  0x17   :  { %387 = vmatpush3.bf16.msra.mxu1 %v386_v4 }
  0x18   :  { %8 = vsyncpa [#allocation3], 0  ;;  %389 = vmatprep.subr.bf16.mxu1 %v388_v9  ;;  %v392_v23 = vpack.c.bf16 %v77_v15, %v76_v14  ;;  %v61_v24 = vld [vmem:[%s660_s1 + $0x168] sm:$0xff]  ;;  %v46_v25 = vld [vmem:[%s660_s1 + $0xf0] sm:$0xff]  ;;  %v95_v27 = vrot.slane %v15_v22, %v94_v13  ;;  %v88_v28 = vcombine.high %v15_v22, %v15_v22  ;;  %v362_v31 = vpack.c.bf16 %v29_v18, %v28_v17 }
  0x19   :  { %v47_v26 = vld [vmem:[%s660_s1 + $0xf8] sm:$0xff]  ;;  %v78_v29 = vld [vmem:[%s660_s1 + $0x1f0] sm:$0xff]  ;;  %359 = vmatpush3.bf16.msra.mxu0 %v358_v16  ;;  %v394_v34 = vpack.c.bf16 %v61_v24, %v60_v21  ;;  %v265_v45 = vld [vmem:[%s661_s2] ss:$0 sm:$0xff]  ;;  %vm249_vm0 = vcmask 74752  }
  0x1a   :  { %v79_v30 = vld [vmem:[%s660_s1 + $0x1f8] sm:$0xff]  ;;  %v103_v32 = vcombine.high %v95_v27, %v95_v27  ;;  %v102_v33 = vrot.slane %v88_v28, %v94_v13  ;;  %361 = vmatprep.subr.bf16.mxu0 %v360_v20  ;;  %v364_v35 = vpack.c.bf16 %v47_v26, %v46_v25  ;;  %v30_v36 = vld [vmem:[%s660_s1 + $0x70] sm:$0xff] }
  0x1b   :  { %391 = vmatpush3.bf16.msra.mxu1 %v390_v19  ;;  %v31_v37 = vld [vmem:[%s660_s1 + $0x78] sm:$0xff]  ;;  %v396_v38 = vpack.c.bf16 %v79_v30, %v78_v29  ;;  %v62_v39 = vld [vmem:[%s660_s1 + $0x170] sm:$0xff] }
  0x1c   :  { %393 = vmatprep.subr.bf16.mxu1 %v392_v23  ;;  %v63_v40 = vld [vmem:[%s660_s1 + $0x178] sm:$0xff]  ;;  %173 = vmatprep.mubr.f32.mxu0 %v103_v32  ;;  %v104_v41 = vcombine.high %v102_v33, %v102_v33  ;;  %v366_v42 = vpack.c.bf16 %v31_v37, %v30_v36  ;;  %s428_s1 = smov [#allocation2]  }
  0x1d   :  { %363 = vmatpush3.bf16.msra.mxu0 %v362_v31  ;;  %v398_v43 = vpack.c.bf16 %v63_v40, %v62_v39  ;;  %s257_s8 = sshll.u32 %s428_s1, 4  ;;  %s258_s8 = int_to_ptr.vmem [resolvable:$true] %s257_s8 }
  0x1e   :  { %243 = vmatprep.mubr.f32.mxu1 %v104_v41  ;;  %365 = vmatprep.subr.bf16.mxu0 %v364_v35  ;;  %s403_s9 = scalar_lea.vmem %s258_s8, 32  ;;  %p408_p1 = scmp.lt.s32.totalorder %s258_s8, %s258_s8 }
  0x1f   :  { %395 = vmatpush3.bf16.msra.mxu1 %v394_v34  ;;  %p404_p0 = scmp.ne.s32.totalorder %s258_s8, %s403_s9  ;;  %p409_p2 = scmp.lt.s32.totalorder %s403_s9, %s403_s9 }
  0x20   :  { %397 = vmatprep.subr.bf16.mxu1 %v396_v38 }
  0x21   :  { %367 = vmatpush3.bf16.msra.mxu0 %v366_v42  ;;  %p410_p3 = por %p409_p2, %p408_p1 }
  0x23   :  { %399 = vmatpush3.bf16.msra.mxu1 %v398_v43  ;;  %p411_p4 = pnand %p410_p3, %p404_p0 }
  0x24   :  { %174 = vmatmul.mubr.f32.vlgmr.msra.gmra.mrb[0].mxu0 %v95_v27 }
  0x26   :  { %244 = vmatmul.mubr.f32.vlgmr.msra.gmra.mrb[0].mxu1 %v102_v33 }
  0xf7   :  { %v298_v44 = vpop.f32.mrb[0].mxu0 }
  0xf8   :  { %v299_v46 = vpop.f32.mrb[1].mxu0 }
  0xf9   :  { %v333_v47 = vpop.f32.mrb[0].mxu1  ;;  %v300_v48 = vadd.f32 %v299_v46, %v298_v44 }
  0xfa   :  { %v334_v49 = vpop.f32.mrb[1].mxu1 }
  0xfb   :  { %v335_v50 = vadd.f32 %v334_v49, %v333_v47  ;;  %v176_v51 = vadd.f32 %v300_v48, %v265_v45 }
  0xfd   :  { %v246_v52 = vadd.f32 %v335_v50, %v176_v51 }
  0xff   :  { %250 = vst.msk [vmem:[#allocation2] sm:$0x3] %vm249_vm0, %v246_v52 }
 0x100   :  { %414 = shalt.err (!%p411_p4)
}
 0x101   :  { %s415_s11 = scalar_lea.hbm %s662_s3, 32 }
 0x102   :  { %p416_p5 = scmp.ne.s32.totalorder %s662_s3, %s415_s11  ;;  %p419_p6 = scmp.lt.u32.totalorder %s415_s11, %s662_s3 }
 0x104   :  { %p421_p7 = pnand %p419_p6, %p416_p5 }
 0x106   :  { %424 = shalt.err (!%p421_p7)
}
 0x107   :  { %260 = dma.vmem_to_hbm [thread:$0]  %s258_s8, 32, %s662_s3, [#allocation3]  }
 0x108   :  { %425 = dma.done.wait [#allocation3], 32  }
 0x109   :  { %426 = vsyncadd [#allocation3], 4294967264 }
 0x10a   :  { %264 = vsyncpa [#allocation3], 1 }

</bundles_post_ra>
